<compile_context>
chip_gen: v5e
topology: v5e:2x2
jax: 0.10.0
libtpu: 0.0.40
codegen_flags: <defaults>
</compile_context>

<pallas_src>
import jax
import jax.numpy as jnp
from jax import lax
from jax.experimental import pallas as pl
from jax.experimental.pallas import tpu as pltpu


def _round_up(x: int, m: int) -> int:
    return (x + m - 1) // m * m


def _padded_tile_bytes(shape, itemsize):
    """VMEM footprint of one block buffer (last dim -> 128 lanes, 2nd-last -> 8)."""
    s = list(shape)
    if len(s) >= 1:
        s[-1] = _round_up(s[-1], 128)
    if len(s) >= 2:
        s[-2] = _round_up(s[-2], 8)
    n = 1
    for d in s:
        n *= d
    return n * itemsize


# ---------------------------------------------------------------------------
# In-kernel helper: bag-sum over one vocab tile via a one-hot count matmul.
# ---------------------------------------------------------------------------
def _bag_sum_tile(tok, emb_ref, base_id, *, sub_chunk=256):
    """Returns (TB, D) float32 partial bag sums for this vocab tile.

    tok     : (TB, L) int32 token ids of the bag block (-1 = pad, never matches)
    emb_ref : (TV, D) table tile ref (bf16 or f32)
    base_id : vocab id of row 0 of this tile

    Counts accumulate in int32 (2 VALU ops/token/vreg); the MXU contraction is
    done in <=sub_chunk-wide pieces to bound vreg pressure and match the
    256-wide MXU granule on v6e/v7x.
    """
    tb, num_tok = tok.shape
    tv, d = emb_ref.shape
    total = jnp.zeros((tb, d), jnp.float32)
    for s in range(0, tv, sub_chunk):
        w = min(sub_chunk, tv - s)
        v_ids = (base_id + s) + lax.broadcasted_iota(jnp.int32, (1, w), 1)
        counts = jnp.zeros((tb, w), jnp.int32)
        # TODO(synk): for very long bags (L >> 64) switch to a chunked
        # lax.fori_loop over tokens to bound unrolled code size / live ranges.
        for l in range(num_tok):
            counts = counts + (tok[:, l:l + 1] == v_ids).astype(jnp.int32)
        # Exact while bag lengths < 256 (bf16 integer range); bf16 x bf16 MXU
        # matmul with f32 accumulation.
        counts_mx = counts.astype(jnp.float32).astype(emb_ref.dtype)
        total = total + jnp.dot(counts_mx, emb_ref[s:s + w, :],
                                preferred_element_type=jnp.float32)
    return total


def _ec_kernel_resident(tok_ref, recip_ref, emb_ref, wt_ref, b_ref, out_ref):
    """Fast path: whole padded table VMEM-resident. Grid = (bag_blocks,)."""
    bag_sum = _bag_sum_tile(tok_ref[...], emb_ref, 0)
    bag_mean = bag_sum * recip_ref[...]
    out_ref[...] = (jnp.dot(bag_mean, wt_ref[...],
                            preferred_element_type=jnp.float32)
                    + b_ref[...]).astype(out_ref.dtype)


def _ec_kernel_streamed(tok_ref, recip_ref, emb_ref, wt_ref, b_ref, out_ref,
                        acc_ref):
    """Streamed path: grid = (bag_blocks, vocab_tiles); table tiles flow
    HBM->VMEM (3-deep pipeline); acc_ref holds running bag sums over the vocab
    axis; 1/len scaling + classifier happen once at the last vocab tile."""
    k = pl.program_id(1)
    tv = emb_ref.shape[0]

    @pl.when(k == 0)
    def _():
        acc_ref[...] = jnp.zeros_like(acc_ref)

    acc_ref[...] += _bag_sum_tile(tok_ref[...], emb_ref, k * tv)

    @pl.when(k == pl.num_programs(1) - 1)
    def _():
        bag_mean = acc_ref[...] * recip_ref[...]          # recip hoisted off k loop
        out_ref[...] = (jnp.dot(bag_mean, wt_ref[...],
                                preferred_element_type=jnp.float32)
                        + b_ref[...]).astype(out_ref.dtype)


# ---------------------------------------------------------------------------
# One-time parameter preparation (hoisted out of the per-call path).
# ---------------------------------------------------------------------------
def prepare_embed_classifier_params(emb_table, fc_w, fc_b, *,
                                    table_dtype=jnp.bfloat16, vocab_align=512):
    """Pad the vocab axis only (D stays unpadded: padding D would multiply the
    dominant HBM stream), cast the table to bf16, pre-transpose / lane-pad the
    classifier weights."""
    V, D = emb_table.shape
    C = fc_w.shape[0]
    V_pad = _round_up(V, vocab_align)
    C_pad = _round_up(C, 128)
    emb_p = jnp.pad(emb_table, ((0, V_pad - V), (0, 0))).astype(table_dtype)
    wt_p = jnp.pad(fc_w.T.astype(jnp.float32), ((0, 0), (0, C_pad - C)))
    b_p = jnp.pad(fc_b.astype(jnp.float32).reshape(1, C), ((0, 0), (0, C_pad - C)))
    return dict(emb=emb_p, wt=wt_p, b=b_p,
                vocab_size=V, embed_dim=D, num_class=C)


def embed_classifier(text, off, params, *, bag_block=256, vocab_block=512,
                     max_bag_len=None, table_vmem_budget_bytes=8 << 20):
    """Forward of the torch module: fc(EmbeddingBag(mode='mean')(text, off)).

    text: (T,) int token stream; off: (B,) bag start offsets (torch contract:
    ascending, off[0]==0, each bag ends at the next offset / T).
    Returns (B, num_class) float32 logits.
    """
    emb_p, wt_p, b_p = params["emb"], params["wt"], params["b"]
    C = params["num_class"]
    V_pad, D = emb_p.shape
    C_pad = wt_p.shape[1]

    text = text.astype(jnp.int32)
    off = off.astype(jnp.int32)
    T = text.shape[0]
    B = off.shape[0]

    # ragged (text, off) -> dense padded (B, L) token matrix + 1/len
    off_ext = jnp.concatenate([off, jnp.array([T], jnp.int32)])
    lens = off_ext[1:] - off_ext[:-1]                                   # (B,)
    if max_bag_len is None:
        max_bag_len = int(jnp.max(lens))      # needs concrete inputs; pass explicitly under jit
    else:
        try:
            assert int(jnp.max(lens)) <= int(max_bag_len), (
                "max_bag_len is smaller than the longest bag; tokens would be dropped")
        except jax.errors.ConcretizationTypeError:
            pass                              # under jit the caller guarantees the bound
    L = _round_up(max(int(max_bag_len), 1), 8)

    col = jnp.arange(L, dtype=jnp.int32)[None, :]
    pos = off[:, None] + col
    valid = col < lens[:, None]
    tok = jnp.where(valid, text[jnp.clip(pos, 0, T - 1)], -1)           # (B, L)
    recip = (1.0 / jnp.maximum(lens, 1).astype(jnp.float32))[:, None]   # (B, 1)
    # empty bags: counts==0 and recip==1 -> mean 0 -> logits == bias (torch semantics)

    # ----- tiling --------------------------------------------------------
    bag_block = max(8, min(bag_block, _round_up(B, 8)))
    B_pad = _round_up(B, bag_block)
    n_bag_blocks = B_pad // bag_block
    # NOTE(v7x): keep n_bag_blocks >= 2 (and even) so megacore can split the
    # 'parallel' bag axis across both TensorCores for large batches.
    tok = jnp.pad(tok, ((0, B_pad - B), (0, 0)), constant_values=-1)
    recip = jnp.pad(recip, ((0, B_pad - B), (0, 0)), constant_values=1.0)

    emb_itemsize = emb_p.dtype.itemsize
    table_bytes = V_pad * D * emb_itemsize

    common_bytes = (
        2 * _padded_tile_bytes((bag_block, L), 4)          # tok
        + 2 * _padded_tile_bytes((bag_block, 1), 4)        # recip
        + 2 * _padded_tile_bytes((D, C_pad), 4)            # W^T
        + 2 * _padded_tile_bytes((1, C_pad), 4)            # bias
        + 2 * _padded_tile_bytes((bag_block, C_pad), 4)    # out
        + _padded_tile_bytes((bag_block, 256), 4)          # counts working set
        + 2 * _padded_tile_bytes((bag_block, D), 4))       # bag-sum / acc

    if table_bytes <= table_vmem_budget_bytes:
        # ---- fast path: table VMEM-resident, no vocab axis, no scratch ----
        vmem_limit = int(min(max(2 * (common_bytes + 2 * table_bytes) + (4 << 20),
                                 16 << 20), 48 << 20))
        out = pl.pallas_call(
            _ec_kernel_resident,
            out_shape=jax.ShapeDtypeStruct((B_pad, C_pad), jnp.float32),
            grid_spec=pltpu.PrefetchScalarGridSpec(
                num_scalar_prefetch=0,
                grid=(n_bag_blocks,),
                in_specs=[
                    pl.BlockSpec((bag_block, L), lambda i: (i, 0)),      # token ids
                    pl.BlockSpec((bag_block, 1), lambda i: (i, 0)),      # 1/len
                    pl.BlockSpec((V_pad, D), lambda i: (0, 0)),          # full table
                    pl.BlockSpec((D, C_pad), lambda i: (0, 0)),          # W^T
                    pl.BlockSpec((1, C_pad), lambda i: (0, 0)),          # bias
                ],
                out_specs=pl.BlockSpec((bag_block, C_pad), lambda i: (i, 0)),
            ),
            compiler_params=pltpu.CompilerParams(
                dimension_semantics=("parallel",),
                vmem_limit_bytes=vmem_limit),
        )(tok, recip, emb_p, wt_p, b_p)
    else:
        # ---- streamed path: table tiles flow through VMEM over a vocab axis ----
        vocab_block = min(vocab_block, V_pad)
        assert V_pad % vocab_block == 0, "vocab_block must divide the padded vocab size"
        n_vocab_tiles = V_pad // vocab_block
        emb_tile_bytes = _padded_tile_bytes((vocab_block, D), emb_itemsize)
        vmem_limit = int(min(max(2 * (common_bytes + 3 * emb_tile_bytes) + (4 << 20),
                                 16 << 20), 48 << 20))
        out = pl.pallas_call(
            _ec_kernel_streamed,
            out_shape=jax.ShapeDtypeStruct((B_pad, C_pad), jnp.float32),
            grid_spec=pltpu.PrefetchScalarGridSpec(
                num_scalar_prefetch=0,
                grid=(n_bag_blocks, n_vocab_tiles),
                in_specs=[
                    pl.BlockSpec((bag_block, L), lambda i, k: (i, 0)),   # token ids
                    pl.BlockSpec((bag_block, 1), lambda i, k: (i, 0)),   # 1/len
                    pl.BlockSpec((vocab_block, D), lambda i, k: (k, 0),  # bf16 table tile
                                 pipeline_mode=pl.Buffered(3)),
                    pl.BlockSpec((D, C_pad), lambda i, k: (0, 0)),       # W^T
                    pl.BlockSpec((1, C_pad), lambda i, k: (0, 0)),       # bias
                ],
                out_specs=pl.BlockSpec((bag_block, C_pad), lambda i, k: (i, 0)),
                scratch_shapes=[pltpu.VMEM((bag_block, D), jnp.float32)],
            ),
            compiler_params=pltpu.CompilerParams(
                dimension_semantics=("parallel", "arbitrary"),
                vmem_limit_bytes=vmem_limit),
        )(tok, recip, emb_p, wt_p, b_p)

    return out[:B, :C]


def _reference(text, off, emb_table, fc_w, fc_b):
    # pure-JAX reference of torch.nn.EmbeddingBag(mode="mean") + Linear
    T = text.shape[0]
    off_ext = jnp.concatenate([off, jnp.array([T], dtype=off.dtype)])
    bags = []
    for i in range(off.shape[0]):
        s, e = int(off_ext[i]), int(off_ext[i + 1])
        rows = emb_table[text[s:e]]
        bags.append(rows.mean(axis=0))
    x = jnp.stack(bags)
    return x @ fc_w.T + fc_b


if __name__ == "__main__":
    vocab_size, embed_dim, num_class = 500, 32, 4
    bag_lens = [3, 5, 2, 7, 4, 1, 6, 3, 5, 2, 4, 6]   # 12 bags, 48 tokens
    num_bags = len(bag_lens)
    total_tokens = sum(bag_lens)

    key = jax.random.PRNGKey(0)
    k_emb, k_w, k_b, k_txt = jax.random.split(key, 4)

    # deterministic synthetic parameters (shapes per the torch module __init__)
    emb_table = jax.random.normal(k_emb, (vocab_size, embed_dim), jnp.float32)
    fc_w = jax.random.normal(k_w, (num_class, embed_dim), jnp.float32) * 0.1
    fc_b = jax.random.normal(k_b, (num_class,), jnp.float32) * 0.1

    # inputs: flat token stream + bag start offsets
    text = jax.random.randint(k_txt, (total_tokens,), 0, vocab_size, jnp.int32)
    starts = [0]
    for ln in bag_lens[:-1]:
        starts.append(starts[-1] + ln)
    off = jnp.array(starts, dtype=jnp.int32)

    # one-time parameter prep (bf16 table, V-only padding, pre-transposed fc)
    params = prepare_embed_classifier_params(emb_table, fc_w, fc_b)

    # 1) fast path: 500x32 bf16 table (32 KB) trivially fits the VMEM budget
    out_resident = embed_classifier(text, off, params)
    # 2) force the streamed path (multi-tile vocab axis + accumulator) as well
    out_streamed = embed_classifier(text, off, params, vocab_block=128,
                                    table_vmem_budget_bytes=0)
    out_resident, out_streamed = jax.block_until_ready((out_resident, out_streamed))

    # reference uses the same bf16-quantized table (deliberate perf choice)
    emb_q = params["emb"][:vocab_size].astype(jnp.float32)
    ref = _reference(text, off, emb_q, fc_w, fc_b)

    assert out_resident.shape == (num_bags, num_class)
    assert out_streamed.shape == (num_bags, num_class)
    assert jnp.allclose(out_resident, ref, atol=1e-3, rtol=1e-3), (out_resident, ref)
    assert jnp.allclose(out_streamed, ref, atol=1e-3, rtol=1e-3), (out_streamed, ref)

    print("KERNEL_OK")
</pallas_src>

<mosaic_0001>
module attributes {stable_mosaic.version = 11 : i64} {
  func.func @_ec_kernel_resident(%arg0: i32, %arg1: memref<16x8xi32, #tpu.memory_space<vmem>>, %arg2: memref<16x1xf32, #tpu.memory_space<vmem>>, %arg3: memref<512x32xbf16, #tpu.memory_space<vmem>>, %arg4: memref<32x128xf32, #tpu.memory_space<vmem>>, %arg5: memref<1x128xf32, #tpu.memory_space<vmem>>, %arg6: memref<16x128xf32, #tpu.memory_space<vmem>>) attributes {dimension_semantics = [#tpu.dimension_semantics<parallel>], iteration_bounds = array<i64: 1>, scalar_prefetch = 0 : i64, scratch_operands = 0 : i64, tpu.core_type = #tpu.core_type<tc>, window_params = [{transform_indices = @transform_0, window_bounds = array<i64: 16, 8>}, {transform_indices = @transform_1, window_bounds = array<i64: 16, 1>}, {pipeline_mode = #tpu.pipeline_mode<synchronous>, transform_indices = @transform_2, window_bounds = array<i64: 512, 32>}, {pipeline_mode = #tpu.pipeline_mode<synchronous>, transform_indices = @transform_3, window_bounds = array<i64: 32, 128>}, {pipeline_mode = #tpu.pipeline_mode<synchronous>, transform_indices = @transform_4, window_bounds = array<i64: 1, 128>}, {transform_indices = @transform_5, window_bounds = array<i64: 16, 128>}]} {
    %c0 = arith.constant 0 : index
    %c0_0 = arith.constant 0 : index
    %0 = vector.load %arg1[%c0, %c0_0] : memref<16x8xi32, #tpu.memory_space<vmem>>, vector<16x8xi32>
    %cst = arith.constant 0.000000e+00 : f32
    %1 = vector.broadcast %cst : f32 to vector<16x32xf32>
    %2 = tpu.iota {dimensions = array<i32: 1>} : vector<1x256xi32>
    %c0_i32 = arith.constant 0 : i32
    %3 = vector.broadcast %c0_i32 : i32 to vector<1x256xi32>
    %4 = arith.addi %3, %2 : vector<1x256xi32>
    %c0_i32_1 = arith.constant 0 : i32
    %5 = vector.broadcast %c0_i32_1 : i32 to vector<16x256xi32>
    %6 = vector.extract_strided_slice %0 {offsets = [0, 0], sizes = [16, 1], strides = [1, 1]} : vector<16x8xi32> to vector<16x1xi32>
    %7 = vector.broadcast %6 : vector<16x1xi32> to vector<16x256xi32>
    %8 = vector.broadcast %4 : vector<1x256xi32> to vector<16x256xi32>
    %9 = arith.cmpi eq, %7, %8 : vector<16x256xi32>
    %10 = arith.extui %9 : vector<16x256xi1> to vector<16x256xi32>
    %11 = arith.addi %5, %10 : vector<16x256xi32>
    %12 = vector.extract_strided_slice %0 {offsets = [0, 1], sizes = [16, 1], strides = [1, 1]} : vector<16x8xi32> to vector<16x1xi32>
    %13 = vector.broadcast %12 : vector<16x1xi32> to vector<16x256xi32>
    %14 = vector.broadcast %4 : vector<1x256xi32> to vector<16x256xi32>
    %15 = arith.cmpi eq, %13, %14 : vector<16x256xi32>
    %16 = arith.extui %15 : vector<16x256xi1> to vector<16x256xi32>
    %17 = arith.addi %11, %16 : vector<16x256xi32>
    %18 = vector.extract_strided_slice %0 {offsets = [0, 2], sizes = [16, 1], strides = [1, 1]} : vector<16x8xi32> to vector<16x1xi32>
    %19 = vector.broadcast %18 : vector<16x1xi32> to vector<16x256xi32>
    %20 = vector.broadcast %4 : vector<1x256xi32> to vector<16x256xi32>
    %21 = arith.cmpi eq, %19, %20 : vector<16x256xi32>
    %22 = arith.extui %21 : vector<16x256xi1> to vector<16x256xi32>
    %23 = arith.addi %17, %22 : vector<16x256xi32>
    %24 = vector.extract_strided_slice %0 {offsets = [0, 3], sizes = [16, 1], strides = [1, 1]} : vector<16x8xi32> to vector<16x1xi32>
    %25 = vector.broadcast %24 : vector<16x1xi32> to vector<16x256xi32>
    %26 = vector.broadcast %4 : vector<1x256xi32> to vector<16x256xi32>
    %27 = arith.cmpi eq, %25, %26 : vector<16x256xi32>
    %28 = arith.extui %27 : vector<16x256xi1> to vector<16x256xi32>
    %29 = arith.addi %23, %28 : vector<16x256xi32>
    %30 = vector.extract_strided_slice %0 {offsets = [0, 4], sizes = [16, 1], strides = [1, 1]} : vector<16x8xi32> to vector<16x1xi32>
    %31 = vector.broadcast %30 : vector<16x1xi32> to vector<16x256xi32>
    %32 = vector.broadcast %4 : vector<1x256xi32> to vector<16x256xi32>
    %33 = arith.cmpi eq, %31, %32 : vector<16x256xi32>
    %34 = arith.extui %33 : vector<16x256xi1> to vector<16x256xi32>
    %35 = arith.addi %29, %34 : vector<16x256xi32>
    %36 = vector.extract_strided_slice %0 {offsets = [0, 5], sizes = [16, 1], strides = [1, 1]} : vector<16x8xi32> to vector<16x1xi32>
    %37 = vector.broadcast %36 : vector<16x1xi32> to vector<16x256xi32>
    %38 = vector.broadcast %4 : vector<1x256xi32> to vector<16x256xi32>
    %39 = arith.cmpi eq, %37, %38 : vector<16x256xi32>
    %40 = arith.extui %39 : vector<16x256xi1> to vector<16x256xi32>
    %41 = arith.addi %35, %40 : vector<16x256xi32>
    %42 = vector.extract_strided_slice %0 {offsets = [0, 6], sizes = [16, 1], strides = [1, 1]} : vector<16x8xi32> to vector<16x1xi32>
    %43 = vector.broadcast %42 : vector<16x1xi32> to vector<16x256xi32>
    %44 = vector.broadcast %4 : vector<1x256xi32> to vector<16x256xi32>
    %45 = arith.cmpi eq, %43, %44 : vector<16x256xi32>
    %46 = arith.extui %45 : vector<16x256xi1> to vector<16x256xi32>
    %47 = arith.addi %41, %46 : vector<16x256xi32>
    %48 = vector.extract_strided_slice %0 {offsets = [0, 7], sizes = [16, 1], strides = [1, 1]} : vector<16x8xi32> to vector<16x1xi32>
    %49 = vector.broadcast %48 : vector<16x1xi32> to vector<16x256xi32>
    %50 = vector.broadcast %4 : vector<1x256xi32> to vector<16x256xi32>
    %51 = arith.cmpi eq, %49, %50 : vector<16x256xi32>
    %52 = arith.extui %51 : vector<16x256xi1> to vector<16x256xi32>
    %53 = arith.addi %47, %52 : vector<16x256xi32>
    %54 = arith.sitofp %53 : vector<16x256xi32> to vector<16x256xf32>
    %55 = arith.truncf %54 : vector<16x256xf32> to vector<16x256xbf16>
    %c0_2 = arith.constant 0 : index
    %c0_3 = arith.constant 0 : index
    %56 = vector.load %arg3[%c0_2, %c0_3] : memref<512x32xbf16, #tpu.memory_space<vmem>>, vector<256x32xbf16>
    %cst_4 = arith.constant dense<0.000000e+00> : vector<16x32xf32>
    %57 = tpu.matmul %55, %56, %cst_4 {dimension_numbers = #tpu.dot_dimension_numbers<[1], [0], [0], [1], [0, 0, 1, 1], [], []>} : vector<16x256xbf16>, vector<256x32xbf16>, vector<16x32xf32> -> vector<16x32xf32>
    %58 = arith.addf %1, %57 : vector<16x32xf32>
    %59 = tpu.iota {dimensions = array<i32: 1>} : vector<1x256xi32>
    %c256_i32 = arith.constant 256 : i32
    %60 = vector.broadcast %c256_i32 : i32 to vector<1x256xi32>
    %61 = arith.addi %60, %59 : vector<1x256xi32>
    %c0_i32_5 = arith.constant 0 : i32
    %62 = vector.broadcast %c0_i32_5 : i32 to vector<16x256xi32>
    %63 = vector.extract_strided_slice %0 {offsets = [0, 0], sizes = [16, 1], strides = [1, 1]} : vector<16x8xi32> to vector<16x1xi32>
    %64 = vector.broadcast %63 : vector<16x1xi32> to vector<16x256xi32>
    %65 = vector.broadcast %61 : vector<1x256xi32> to vector<16x256xi32>
    %66 = arith.cmpi eq, %64, %65 : vector<16x256xi32>
    %67 = arith.extui %66 : vector<16x256xi1> to vector<16x256xi32>
    %68 = arith.addi %62, %67 : vector<16x256xi32>
    %69 = vector.extract_strided_slice %0 {offsets = [0, 1], sizes = [16, 1], strides = [1, 1]} : vector<16x8xi32> to vector<16x1xi32>
    %70 = vector.broadcast %69 : vector<16x1xi32> to vector<16x256xi32>
    %71 = vector.broadcast %61 : vector<1x256xi32> to vector<16x256xi32>
    %72 = arith.cmpi eq, %70, %71 : vector<16x256xi32>
    %73 = arith.extui %72 : vector<16x256xi1> to vector<16x256xi32>
    %74 = arith.addi %68, %73 : vector<16x256xi32>
    %75 = vector.extract_strided_slice %0 {offsets = [0, 2], sizes = [16, 1], strides = [1, 1]} : vector<16x8xi32> to vector<16x1xi32>
    %76 = vector.broadcast %75 : vector<16x1xi32> to vector<16x256xi32>
    %77 = vector.broadcast %61 : vector<1x256xi32> to vector<16x256xi32>
    %78 = arith.cmpi eq, %76, %77 : vector<16x256xi32>
    %79 = arith.extui %78 : vector<16x256xi1> to vector<16x256xi32>
    %80 = arith.addi %74, %79 : vector<16x256xi32>
    %81 = vector.extract_strided_slice %0 {offsets = [0, 3], sizes = [16, 1], strides = [1, 1]} : vector<16x8xi32> to vector<16x1xi32>
    %82 = vector.broadcast %81 : vector<16x1xi32> to vector<16x256xi32>
    %83 = vector.broadcast %61 : vector<1x256xi32> to vector<16x256xi32>
    %84 = arith.cmpi eq, %82, %83 : vector<16x256xi32>
    %85 = arith.extui %84 : vector<16x256xi1> to vector<16x256xi32>
    %86 = arith.addi %80, %85 : vector<16x256xi32>
    %87 = vector.extract_strided_slice %0 {offsets = [0, 4], sizes = [16, 1], strides = [1, 1]} : vector<16x8xi32> to vector<16x1xi32>
    %88 = vector.broadcast %87 : vector<16x1xi32> to vector<16x256xi32>
    %89 = vector.broadcast %61 : vector<1x256xi32> to vector<16x256xi32>
    %90 = arith.cmpi eq, %88, %89 : vector<16x256xi32>
    %91 = arith.extui %90 : vector<16x256xi1> to vector<16x256xi32>
    %92 = arith.addi %86, %91 : vector<16x256xi32>
    %93 = vector.extract_strided_slice %0 {offsets = [0, 5], sizes = [16, 1], strides = [1, 1]} : vector<16x8xi32> to vector<16x1xi32>
    %94 = vector.broadcast %93 : vector<16x1xi32> to vector<16x256xi32>
    %95 = vector.broadcast %61 : vector<1x256xi32> to vector<16x256xi32>
    %96 = arith.cmpi eq, %94, %95 : vector<16x256xi32>
    %97 = arith.extui %96 : vector<16x256xi1> to vector<16x256xi32>
    %98 = arith.addi %92, %97 : vector<16x256xi32>
    %99 = vector.extract_strided_slice %0 {offsets = [0, 6], sizes = [16, 1], strides = [1, 1]} : vector<16x8xi32> to vector<16x1xi32>
    %100 = vector.broadcast %99 : vector<16x1xi32> to vector<16x256xi32>
    %101 = vector.broadcast %61 : vector<1x256xi32> to vector<16x256xi32>
    %102 = arith.cmpi eq, %100, %101 : vector<16x256xi32>
    %103 = arith.extui %102 : vector<16x256xi1> to vector<16x256xi32>
    %104 = arith.addi %98, %103 : vector<16x256xi32>
    %105 = vector.extract_strided_slice %0 {offsets = [0, 7], sizes = [16, 1], strides = [1, 1]} : vector<16x8xi32> to vector<16x1xi32>
    %106 = vector.broadcast %105 : vector<16x1xi32> to vector<16x256xi32>
    %107 = vector.broadcast %61 : vector<1x256xi32> to vector<16x256xi32>
    %108 = arith.cmpi eq, %106, %107 : vector<16x256xi32>
    %109 = arith.extui %108 : vector<16x256xi1> to vector<16x256xi32>
    %110 = arith.addi %104, %109 : vector<16x256xi32>
    %111 = arith.sitofp %110 : vector<16x256xi32> to vector<16x256xf32>
    %112 = arith.truncf %111 : vector<16x256xf32> to vector<16x256xbf16>
    %c256 = arith.constant 256 : index
    %c0_6 = arith.constant 0 : index
    %113 = vector.load %arg3[%c256, %c0_6] : memref<512x32xbf16, #tpu.memory_space<vmem>>, vector<256x32xbf16>
    %cst_7 = arith.constant dense<0.000000e+00> : vector<16x32xf32>
    %114 = tpu.matmul %112, %113, %cst_7 {dimension_numbers = #tpu.dot_dimension_numbers<[1], [0], [0], [1], [0, 0, 1, 1], [], []>} : vector<16x256xbf16>, vector<256x32xbf16>, vector<16x32xf32> -> vector<16x32xf32>
    %115 = arith.addf %58, %114 : vector<16x32xf32>
    %c0_8 = arith.constant 0 : index
    %c0_9 = arith.constant 0 : index
    %116 = vector.load %arg2[%c0_8, %c0_9] : memref<16x1xf32, #tpu.memory_space<vmem>>, vector<16x1xf32>
    %117 = vector.broadcast %116 : vector<16x1xf32> to vector<16x32xf32>
    %118 = arith.mulf %115, %117 : vector<16x32xf32>
    %c0_10 = arith.constant 0 : index
    %c0_11 = arith.constant 0 : index
    %119 = vector.load %arg4[%c0_10, %c0_11] : memref<32x128xf32, #tpu.memory_space<vmem>>, vector<32x128xf32>
    %cst_12 = arith.constant dense<0.000000e+00> : vector<16x128xf32>
    %120 = tpu.matmul %118, %119, %cst_12 {dimension_numbers = #tpu.dot_dimension_numbers<[1], [0], [0], [1], [0, 0, 1, 1], [], []>} : vector<16x32xf32>, vector<32x128xf32>, vector<16x128xf32> -> vector<16x128xf32>
    %c0_13 = arith.constant 0 : index
    %c0_14 = arith.constant 0 : index
    %121 = vector.load %arg5[%c0_13, %c0_14] : memref<1x128xf32, #tpu.memory_space<vmem>>, vector<1x128xf32>
    %122 = vector.broadcast %121 : vector<1x128xf32> to vector<16x128xf32>
    %123 = arith.addf %120, %122 : vector<16x128xf32>
    %c0_15 = arith.constant 0 : index
    %c0_16 = arith.constant 0 : index
    %124 = vector.load %arg6[%c0_15, %c0_16] : memref<16x128xf32, #tpu.memory_space<vmem>>, vector<16x128xf32>
    tpu.vector_store %arg6[%c0_15, %c0_16], %123 {strides = array<i32>} : memref<16x128xf32, #tpu.memory_space<vmem>>, vector<16x128xf32>,
    return
  }
  func.func @transform_0(%arg0: i32) -> (i32, i32) {
    %c0_i32 = arith.constant 0 : i32
    %c0_i32_0 = arith.constant 0 : i32
    return %arg0, %c0_i32 : i32, i32
  }
  func.func @transform_1(%arg0: i32) -> (i32, i32) {
    %c0_i32 = arith.constant 0 : i32
    %c0_i32_0 = arith.constant 0 : i32
    return %arg0, %c0_i32 : i32, i32
  }
  func.func @transform_2(%arg0: i32) -> (i32, i32) {
    %c0_i32 = arith.constant 0 : i32
    %c0_i32_0 = arith.constant 0 : i32
    %c0_i32_1 = arith.constant 0 : i32
    return %c0_i32, %c0_i32_0 : i32, i32
  }
  func.func @transform_3(%arg0: i32) -> (i32, i32) {
    %c0_i32 = arith.constant 0 : i32
    %c0_i32_0 = arith.constant 0 : i32
    %c0_i32_1 = arith.constant 0 : i32
    return %c0_i32, %c0_i32_0 : i32, i32
  }
  func.func @transform_4(%arg0: i32) -> (i32, i32) {
    %c0_i32 = arith.constant 0 : i32
    %c0_i32_0 = arith.constant 0 : i32
    %c0_i32_1 = arith.constant 0 : i32
    return %c0_i32, %c0_i32_0 : i32, i32
  }
  func.func @transform_5(%arg0: i32) -> (i32, i32) {
    %c0_i32 = arith.constant 0 : i32
    %c0_i32_0 = arith.constant 0 : i32
    return %arg0, %c0_i32 : i32, i32
  }
}

</mosaic_0001>

<bundles_post_ra>
// kernel: tpu_custom_call.1
= control target key start
LH: loop header
LB: loop body
LE: loop exit
PB: predicated region body
PF: predicated region fallthrough
CT: control target
= control target key end

     0   :  { %v875_v1 = vmov 1   ;;  %v876_v2 = vmov 0   ;;  %s1349_s0 = inlined_call_operand.vmem [shape: s32[16,8], index: 0, kind: input, shape index: {}]   ;;  %s1350_s1 = inlined_call_operand.vmem [shape: f32[16,1], index: 1, kind: input, shape index: {}]   ;;  %s1351_s2 = inlined_call_operand.vmem [shape: bf16[512,32], index: 2, kind: input, shape index: {}]   ;;  %s1352_s3 = inlined_call_operand.vmem [shape: f32[32,128], index: 3, kind: input, shape index: {}]   ;;  %s1353_s4 = inlined_call_operand.vmem [shape: f32[1,128], index: 4, kind: input, shape index: {}]   ;;  %s1354_s5 = inlined_call_operand.hbm [shape: f32[16,128], index: 5, kind: output, shape index: {}]  }
   0x1   :  { %v21_v0 = vld [vmem:[%s1349_s0] sm:$0xff]  ;;  %834 = vset.pattern.permute.xlu1 %v875_v1  ;;  %833 = vset.pattern.permute.xlu0 %v876_v2 }
   0x2   :  { %41 = vperm.xlu1 %834, %v21_v0   ;;  %27 = vperm.xlu0 %833, %v21_v0  }
   0x3   :  { %10 = vsyncpa [#allocation3], 0  ;;  %v877_v3 = vmov 2   ;;  %v22_v4 = vld [vmem:[%s1349_s0 + $0x8] sm:$0xff]  ;;  %v878_v5 = vmov 3   ;;  %v879_v6 = vmov 4   ;;  %v23_v11 = vlaneseq }
   0x4   :  { %835 = vset.pattern.permute.xlu2 %v877_v3  ;;  %v880_v7 = vmov 5   ;;  %v881_v8 = vmov 6   ;;  %v882_v9 = vmov 7   ;;  %v809_v14 = vld [vmem:[%s1351_s2 + $0xb8] sm:$0xff]  ;;  %v808_v18 = vld [vmem:[%s1351_s2 + $0xb0] sm:$0xff]  ;;  %v807_v26 = vld [vmem:[%s1351_s2 + $0xa8] sm:$0xff] }
   0x5   :  { %59 = vperm.xlu2 %835, %v21_v0   ;;  %v929_v13 = vand.u32 127, %v23_v11  ;;  %v817_v15 = vld [vmem:[%s1351_s2 + $0xf8] sm:$0xff]  ;;  %432 = vmatpush.bf16.msra.mxu0 %v809_v14  ;;  %v816_v19 = vld [vmem:[%s1351_s2 + $0xf0] sm:$0xff]  ;;  %v815_v27 = vld [vmem:[%s1351_s2 + $0xe8] sm:$0xff]  ;;  %s883_s19 = smov [#allocation2]   ;;  %s644_s22 = sshll.u32 %s1354_s5, 4  ;;  %s645_s22 = int_to_ptr.hbm [resolvable:$true] %s644_s22 }
   0x6   :  { %v793_v16 = vld [vmem:[%s1351_s2 + $0x38] sm:$0xff]  ;;  %446 = vmatpush.bf16.msra.mxu1 %v817_v15  ;;  %v792_v21 = vld [vmem:[%s1351_s2 + $0x30] sm:$0xff]  ;;  %v791_v28 = vld [vmem:[%s1351_s2 + $0x28] sm:$0xff]  ;;  %s642_s20 = sshll.u32 %s883_s19, 4  ;;  %s884_s23 = smov 128   ;;  %s643_s20 = int_to_ptr.vmem [resolvable:$true] %s642_s20 }
   0x7   :  { %v801_v17 = vld [vmem:[%s1351_s2 + $0x78] sm:$0xff]  ;;  %v950_v20 = vadd.s32 128, %v929_v13  ;;  %556 = vmatpush.bf16.msra.mxu2 %v793_v16  ;;  %v800_v22 = vld [vmem:[%s1351_s2 + $0x70] sm:$0xff]  ;;  %v959_v23 = vadd.s32 256, %v929_v13  ;;  %v799_v31 = vld [vmem:[%s1351_s2 + $0x68] sm:$0xff]  ;;  %s885_s24 = smov 8  }
   0x8   :  { %570 = vmatpush.bf16.msra.mxu3 %v801_v17  ;;  %v806_v32 = vld [vmem:[%s1351_s2 + $0xa0] sm:$0xff]  ;;  %v805_v39 = vld [vmem:[%s1351_s2 + $0x98] sm:$0xff]  ;;  %v804_v54 = vld [vmem:[%s1351_s2 + $0x90] sm:$0xff] }
   0x9   :  { %433 = vmatpush.bf16.msra.mxu0 %v808_v18  ;;  %v962_v24 = vadd.s32 256, %v950_v20  ;;  %v814_v33 = vld [vmem:[%s1351_s2 + $0xe0] sm:$0xff]  ;;  %v813_v40 = vld [vmem:[%s1351_s2 + $0xd8] sm:$0xff]  ;;  %v812_v60 = vld [vmem:[%s1351_s2 + $0xd0] sm:$0xff] }
   0xa   :  { %44 = vperm.xlu1 %834, %v22_v4   ;;  %30 = vperm.xlu0 %833, %v22_v4   ;;  %v790_v37 = vld [vmem:[%s1351_s2 + $0x20] sm:$0xff]  ;;  %v789_v42 = vld [vmem:[%s1351_s2 + $0x18] sm:$0xff]  ;;  %v788_v1 = vld [vmem:[%s1351_s2 + $0x10] sm:$0xff] }
   0xb   :  { %447 = vmatpush.bf16.msra.mxu1 %v816_v19  ;;  %557 = vmatpush.bf16.msra.mxu2 %v792_v21  ;;  %v798_v38 = vld [vmem:[%s1351_s2 + $0x60] sm:$0xff]  ;;  %v797_v48 = vld [vmem:[%s1351_s2 + $0x58] sm:$0xff]  ;;  %v795_v16 = vld [vmem:[%s1351_s2 + $0x48] sm:$0xff] }
   0xc   :  { %571 = vmatpush.bf16.msra.mxu3 %v800_v22 }
   0xd   :  { %62 = vperm.xlu2 %835, %v22_v4   ;;  %434 = vmatpush.bf16.msra.mxu0 %v807_v26 }
   0xf   :  { %448 = vmatpush.bf16.msra.mxu1 %v815_v27  ;;  %558 = vmatpush.bf16.msra.mxu2 %v791_v28 }
  0x10   :  { %572 = vmatpush.bf16.msra.mxu3 %v799_v31 }
  0x11   :  { %435 = vmatpush.bf16.msra.mxu0 %v806_v32 }
  0x12   :  { %837 = vset.pattern.permute.xlu1 %v878_v5  ;;  %836 = vset.pattern.permute.xlu0 %v878_v5 }
  0x13   :  { %80 = vperm.xlu1 %837, %v22_v4   ;;  %77 = vperm.xlu0 %836, %v21_v0  }
  0x14   :  { %449 = vmatpush.bf16.msra.mxu1 %v814_v33  ;;  %559 = vmatpush.bf16.msra.mxu2 %v790_v37  ;;  %v786_v37 = vld [vmem:[%s1351_s2] sm:$0xff] }
  0x15   :  { %838 = vset.pattern.permute.xlu2 %v879_v6  ;;  %573 = vmatpush.bf16.msra.mxu3 %v798_v38 }
  0x16   :  { %95 = vperm.xlu2 %838, %v21_v0   ;;  %436 = vmatpush.bf16.msra.mxu0 %v805_v39 }
  0x18   :  { %450 = vmatpush.bf16.msra.mxu1 %v813_v40  ;;  %560 = vmatpush.bf16.msra.mxu2 %v789_v42  ;;  %v794_v42 = vld [vmem:[%s1351_s2 + $0x40] sm:$0xff] }
  0x19   :  { %574 = vmatpush.bf16.msra.mxu3 %v797_v48 }
  0x1a   :  { %437 = vmatpush.bf16.msra.mxu0 %v804_v54 }
  0x1b   :  { %839 = vset.pattern.permute.xlu1 %v879_v6  ;;  %841 = vset.pattern.permute.xlu0 %v880_v7 }
  0x1c   :  { %98 = vperm.xlu1 %839, %v22_v4   ;;  %116 = vperm.xlu0 %841, %v22_v4  }
  0x1d   :  { %451 = vmatpush.bf16.msra.mxu1 %v812_v60  ;;  %561 = vmatpush.bf16.msra.mxu2 %v788_v1 }
  0x1e   :  { %840 = vset.pattern.permute.xlu2 %v880_v7  ;;  %v796_v7 = vld [vmem:[%s1351_s2 + $0x50] sm:$0xff] }
  0x1f   :  { %113 = vperm.xlu2 %840, %v21_v0   ;;  %575 = vmatpush.bf16.msra.mxu3 %v796_v7 }
  0x23   :  { %576 = vmatpush.bf16.msra.mxu3 %v795_v16 }
  0x24   :  { %842 = vset.pattern.permute.xlu1 %v881_v8  ;;  %846 = vset.pattern.permute.xlu0 %v876_v2 }
  0x25   :  { %131 = vperm.xlu1 %842, %v21_v0  }
  0x27   :  { %843 = vset.pattern.permute.xlu2 %v881_v8  ;;  %v803_v8 = vld [vmem:[%s1351_s2 + $0x88] sm:$0xff]  ;;  %577 = vmatpush.bf16.msra.mxu3 %v794_v42 }
  0x28   :  { %134 = vperm.xlu2 %843, %v22_v4   ;;  %438 = vmatpush.bf16.msra.mxu0 %v803_v8 }
  0x2d   :  { %844 = vset.pattern.permute.xlu1 %v882_v9 }
  0x2e   :  { %149 = vperm.xlu1 %844, %v21_v0  }
  0x30   :  { %845 = vset.pattern.permute.xlu2 %v882_v9  ;;  %v811_v9 = vld [vmem:[%s1351_s2 + $0xc8] sm:$0xff] }
  0x31   :  { %152 = vperm.xlu2 %845, %v22_v4   ;;  %452 = vmatpush.bf16.msra.mxu1 %v811_v9 }
  0x36   :  { %847 = vset.pattern.permute.xlu1 %v876_v2 }
  0x5f   :  { %v925_v10 = vpop.permute.xlu2 %59 }
  0x60   :  { %vm64_vm0 = vcmp.eq.s32.totalorder %v925_v10, %v929_v13  ;;  %vm65_vm1 = vcmp.eq.s32.totalorder %v925_v10, %v950_v20  ;;  %vm226_vm2 = vcmp.eq.s32.totalorder %v925_v10, %v959_v23  ;;  %vm227_vm3 = vcmp.eq.s32.totalorder %v925_v10, %v962_v24  ;;  %v787_v10 = vld [vmem:[%s1351_s2 + $0x8] sm:$0xff] }
  0x61   :  { %v993_v34 = vsel %vm64_vm0, 1, %v876_v2  ;;  %v996_v35 = vsel %vm65_vm1, 1, %v876_v2  ;;  %v999_v36 = vsel %vm226_vm2, 1, %v876_v2  ;;  %v1035_v41 = vsel %vm227_vm3, 1, %v876_v2  ;;  %562 = vmatpush.bf16.msra.mxu2 %v787_v10 }
  0x65   :  { %563 = vmatpush.bf16.msra.mxu2 %v786_v37 }
  0x67   :  { %v927_v12 = vpop.permute.xlu2 %62 }
  0x68   :  { %vm66_vm4 = vcmp.eq.s32.totalorder %v927_v12, %v929_v13  ;;  %vm67_vm5 = vcmp.eq.s32.totalorder %v927_v12, %v950_v20  ;;  %vm228_vm6 = vcmp.eq.s32.totalorder %v927_v12, %v959_v23  ;;  %vm229_vm7 = vcmp.eq.s32.totalorder %v927_v12, %v962_v24 }
  0x69   :  { %v1080_v55 = vsel %vm66_vm4, 1, %v876_v2  ;;  %v1086_v56 = vsel %vm67_vm5, 1, %v876_v2  ;;  %v1092_v57 = vsel %vm228_vm6, 1, %v876_v2  ;;  %v1098_v58 = vsel %vm229_vm7, 1, %v876_v2 }
  0x70   :  { %v964_v25 = vpop.permute.xlu2 %95 }
  0x71   :  { %vm101_vm1 = vcmp.eq.s32.totalorder %v964_v25, %v950_v20  ;;  %vm250_vm2 = vcmp.eq.s32.totalorder %v964_v25, %v959_v23  ;;  %vm251_vm8 = vcmp.eq.s32.totalorder %v964_v25, %v962_v24  ;;  %vm1355_vm3 = vcmp.eq.s32.totalorder %v964_v25, %v929_v13  ;;  %v802_v25 = vld [vmem:[%s1351_s2 + $0x80] sm:$0xff] }
  0x72   :  { %v1107_v61 = vsel %vm1355_vm3, 1, %v876_v2  ;;  %v1113_v62 = vsel %vm101_vm1, 1, %v876_v2  ;;  %v1119_v63 = vsel %vm250_vm2, 1, %v876_v2  ;;  %v1125_v0 = vsel %vm251_vm8, 1, %v876_v2  ;;  %439 = vmatpush.bf16.msra.mxu0 %v802_v25 }
  0x74   :  { %v42_v29 = vpop.permute.xlu1 %41  ;;  %v28_v30 = vpop.permute.xlu0 %27 }
  0x75   :  { %vm46_vm9 = vcmp.eq.s32.totalorder %v42_v29, %v929_v13  ;;  %vm47_vm10 = vcmp.eq.s32.totalorder %v42_v29, %v950_v20  ;;  %vm214_vm11 = vcmp.eq.s32.totalorder %v42_v29, %v959_v23  ;;  %vm215_vm12 = vcmp.eq.s32.totalorder %v42_v29, %v962_v24 }
  0x76   :  { %vm32_vm13 = vcmp.eq.s32.totalorder %v28_v30, %v929_v13  ;;  %vm33_vm14 = vcmp.eq.s32.totalorder %v28_v30, %v950_v20  ;;  %vm206_vm15 = vcmp.eq.s32.totalorder %v28_v30, %v959_v23  ;;  %vm207_vm0 = vcmp.eq.s32.totalorder %v28_v30, %v962_v24  ;;  %v810_v30 = vld [vmem:[%s1351_s2 + $0xc0] sm:$0xff] }
  0x77   :  { %v50_v43 = vsel %vm46_vm9, 1, %v876_v2  ;;  %v51_v44 = vsel %vm47_vm10, 1, %v876_v2  ;;  %v218_v45 = vsel %vm214_vm11, 1, %v876_v2  ;;  %v219_v46 = vsel %vm215_vm12, 1, %v876_v2  ;;  %453 = vmatpush.bf16.msra.mxu1 %v810_v30 }
  0x78   :  { %v36_v49 = vsel %vm32_vm13, 1, %v876_v2  ;;  %v37_v50 = vsel %vm33_vm14, 1, %v876_v2  ;;  %v210_v51 = vsel %vm206_vm15, 1, %v876_v2  ;;  %v211_v52 = vsel %vm207_vm0, 1, %v876_v2 }
  0x79   :  { %v114_v59 = vpop.permute.xlu2 %113  ;;  %v54_v3 = vadd.s32 %v50_v43, %v36_v49  ;;  %v55_v4 = vadd.s32 %v51_v44, %v37_v50  ;;  %v222_v5 = vadd.s32 %v218_v45, %v210_v51  ;;  %v223_v6 = vadd.s32 %v219_v46, %v211_v52 }
  0x7a   :  { %vm118_vm12 = vcmp.eq.s32.totalorder %v114_v59, %v929_v13  ;;  %vm119_vm13 = vcmp.eq.s32.totalorder %v114_v59, %v950_v20  ;;  %vm262_vm14 = vcmp.eq.s32.totalorder %v114_v59, %v959_v23  ;;  %vm263_vm15 = vcmp.eq.s32.totalorder %v114_v59, %v962_v24 }
  0x7b   :  { %v1187_v26 = vsel %vm118_vm12, 1, %v876_v2  ;;  %v1192_v27 = vsel %vm119_vm13, 1, %v876_v2  ;;  %v1197_v28 = vsel %vm262_vm14, 1, %v876_v2  ;;  %v1202_v29 = vsel %vm263_vm15, 1, %v876_v2 }
  0x7c   :  { %v45_v47 = vpop.permute.xlu1 %44  ;;  %v31_v53 = vpop.permute.xlu0 %30  ;;  %v72_v43 = vadd.s32 %v993_v34, %v54_v3  ;;  %v73_v44 = vadd.s32 %v996_v35, %v55_v4  ;;  %v235_v34 = vadd.s32 %v1035_v41, %v223_v6  ;;  %v584_v35 = vld [vmem:[%s1350_s1] sm:$0xff] }
  0x7d   :  { %vm48_vm4 = vcmp.eq.s32.totalorder %v45_v47, %v929_v13  ;;  %vm49_vm5 = vcmp.eq.s32.totalorder %v45_v47, %v950_v20  ;;  %vm34_vm6 = vcmp.eq.s32.totalorder %v31_v53, %v929_v13  ;;  %vm35_vm7 = vcmp.eq.s32.totalorder %v31_v53, %v950_v20  ;;  %588 = vperm.xlu0 %846, %v584_v35  }
  0x7e   :  { %vm216_vm8 = vcmp.eq.s32.totalorder %v45_v47, %v959_v23  ;;  %vm217_vm9 = vcmp.eq.s32.totalorder %v45_v47, %v962_v24  ;;  %vm208_vm10 = vcmp.eq.s32.totalorder %v31_v53, %v959_v23  ;;  %vm209_vm11 = vcmp.eq.s32.totalorder %v31_v53, %v962_v24 }
  0x7f   :  { %v52_v11 = vsel %vm48_vm4, 1, %v876_v2  ;;  %v53_v12 = vsel %vm49_vm5, 1, %v876_v2  ;;  %v38_v14 = vsel %vm34_vm6, 1, %v876_v2  ;;  %v39_v15 = vsel %vm35_vm7, 1, %v876_v2 }
  0x80   :  { %v220_v17 = vsel %vm216_vm8, 1, %v876_v2  ;;  %v221_v18 = vsel %vm217_vm9, 1, %v876_v2  ;;  %v212_v19 = vsel %vm208_vm10, 1, %v876_v2  ;;  %v213_v21 = vsel %vm209_vm11, 1, %v876_v2 }
  0x81   :  { %v56_v31 = vadd.s32 %v52_v11, %v38_v14  ;;  %v57_v32 = vadd.s32 %v53_v12, %v39_v15  ;;  %v224_v38 = vadd.s32 %v220_v17, %v212_v19  ;;  %v225_v39 = vadd.s32 %v221_v18, %v213_v21 }
  0x82   :  { %v1214_v40 = vpop.permute.xlu2 %134  ;;  %v234_v47 = vadd.s32 %v999_v36, %v222_v5  ;;  %v585_v36 = vld [vmem:[%s1350_s1 + $0x8] sm:$0xff] }
  0x83   :  { %vm138_vm4 = vcmp.eq.s32.totalorder %v1214_v40, %v929_v13  ;;  %vm139_vm5 = vcmp.eq.s32.totalorder %v1214_v40, %v950_v20  ;;  %v74_v48 = vadd.s32 %v1080_v55, %v56_v31  ;;  %v75_v49 = vadd.s32 %v1086_v56, %v57_v32  ;;  %593 = vperm.xlu1 %847, %v585_v36  }
  0x84   :  { %vm276_vm6 = vcmp.eq.s32.totalorder %v1214_v40, %v959_v23  ;;  %vm277_vm7 = vcmp.eq.s32.totalorder %v1214_v40, %v962_v24  ;;  %v236_v41 = vadd.s32 %v1092_v57, %v224_v38  ;;  %v237_v52 = vadd.s32 %v1098_v58, %v225_v39 }
  0x85   :  { %v81_v22 = vpop.permute.xlu1 %80  ;;  %v78_v33 = vpop.permute.xlu0 %77  ;;  %v1257_v53 = vsel %vm138_vm4, 1, %v876_v2  ;;  %v1263_v54 = vsel %vm139_vm5, 1, %v876_v2  ;;  %v280_v31 = vsel %vm276_vm6, 1, %v876_v2  ;;  %v281_v32 = vsel %vm277_vm7, 1, %v876_v2 }
  0x86   :  { %vm84_vm0 = vcmp.eq.s32.totalorder %v81_v22, %v929_v13  ;;  %vm85_vm1 = vcmp.eq.s32.totalorder %v81_v22, %v950_v20  ;;  %vm240_vm2 = vcmp.eq.s32.totalorder %v81_v22, %v959_v23  ;;  %vm241_vm3 = vcmp.eq.s32.totalorder %v81_v22, %v962_v24 }
  0x87   :  { %v88_v45 = vsel %vm84_vm0, 1, %v876_v2  ;;  %v89_v46 = vsel %vm85_vm1, 1, %v876_v2  ;;  %v244_v50 = vsel %vm240_vm2, 1, %v876_v2  ;;  %v245_v51 = vsel %vm241_vm3, 1, %v876_v2 }
  0x88   :  { %v92_v55 = vadd.s32 %v88_v45, %v74_v48  ;;  %v93_v56 = vadd.s32 %v89_v46, %v75_v49  ;;  %vm82_vm8 = vcmp.eq.s32.totalorder %v78_v33, %v929_v13  ;;  %vm83_vm9 = vcmp.eq.s32.totalorder %v78_v33, %v950_v20 }
  0x89   :  { %v248_v57 = vadd.s32 %v244_v50, %v236_v41  ;;  %v249_v58 = vadd.s32 %v245_v51, %v237_v52  ;;  %vm238_vm10 = vcmp.eq.s32.totalorder %v78_v33, %v959_v23  ;;  %vm239_vm11 = vcmp.eq.s32.totalorder %v78_v33, %v962_v24 }
  0x8a   :  { %v86_v1 = vsel %vm82_vm8, 1, %v876_v2  ;;  %v87_v3 = vsel %vm83_vm9, 1, %v876_v2  ;;  %v242_v6 = vsel %vm238_vm10, 1, %v876_v2  ;;  %v243_v7 = vsel %vm239_vm11, 1, %v876_v2 }
  0x8b   :  { %v90_v10 = vadd.s32 %v86_v1, %v72_v43  ;;  %v91_v11 = vadd.s32 %v87_v3, %v73_v44  ;;  %v153_v15 = vpop.permute.xlu2 %152  ;;  %v246_v21 = vadd.s32 %v242_v6, %v234_v47  ;;  %v247_v22 = vadd.s32 %v243_v7, %v235_v34 }
  0x8c   :  { %vm156_vm4 = vcmp.eq.s32.totalorder %v153_v15, %v929_v13  ;;  %vm157_vm5 = vcmp.eq.s32.totalorder %v153_v15, %v950_v20  ;;  %vm288_vm8 = vcmp.eq.s32.totalorder %v153_v15, %v959_v23  ;;  %vm289_vm9 = vcmp.eq.s32.totalorder %v153_v15, %v962_v24 }
  0x8d   :  { %v108_v39 = vadd.s32 %v1107_v61, %v90_v10  ;;  %v109_v42 = vadd.s32 %v1113_v62, %v91_v11  ;;  %v258_v40 = vadd.s32 %v1119_v63, %v246_v21  ;;  %v259_v45 = vadd.s32 %v1125_v0, %v247_v22 }
  0x8e   :  { %v99_v59 = vpop.permute.xlu1 %98  ;;  %v117_v60 = vpop.permute.xlu0 %116  ;;  %v160_v46 = vsel %vm156_vm4, 1, %v876_v2  ;;  %v161_v47 = vsel %vm157_vm5, 1, %v876_v2  ;;  %v292_v61 = vsel %vm288_vm8, 1, %v876_v2  ;;  %v293_v62 = vsel %vm289_vm9, 1, %v876_v2 }
  0x8f   :  { %vm102_vm12 = vcmp.eq.s32.totalorder %v99_v59, %v929_v13  ;;  %vm103_vm13 = vcmp.eq.s32.totalorder %v99_v59, %v950_v20  ;;  %vm252_vm14 = vcmp.eq.s32.totalorder %v99_v59, %v959_v23  ;;  %vm253_vm15 = vcmp.eq.s32.totalorder %v99_v59, %v962_v24 }
  0x90   :  { %v256_v4 = vsel %vm252_vm14, 1, %v876_v2  ;;  %v257_v5 = vsel %vm253_vm15, 1, %v876_v2  ;;  %v106_v8 = vsel %vm102_vm12, 1, %v876_v2  ;;  %v107_v9 = vsel %vm103_vm13, 1, %v876_v2 }
  0x91   :  { %vm120_vm0 = vcmp.eq.s32.totalorder %v117_v60, %v929_v13  ;;  %vm121_vm1 = vcmp.eq.s32.totalorder %v117_v60, %v950_v20  ;;  %vm264_vm2 = vcmp.eq.s32.totalorder %v117_v60, %v959_v23  ;;  %vm265_vm3 = vcmp.eq.s32.totalorder %v117_v60, %v962_v24 }
  0x92   :  { %v260_v12 = vadd.s32 %v256_v4, %v248_v57  ;;  %v261_v14 = vadd.s32 %v257_v5, %v249_v58  ;;  %v110_v16 = vadd.s32 %v106_v8, %v92_v55  ;;  %v111_v17 = vadd.s32 %v107_v9, %v93_v56 }
  0x93   :  { %v268_v18 = vsel %vm264_vm2, 1, %v876_v2  ;;  %v269_v19 = vsel %vm265_vm3, 1, %v876_v2  ;;  %v124_v25 = vsel %vm120_vm0, 1, %v876_v2  ;;  %v125_v30 = vsel %vm121_vm1, 1, %v876_v2 }
  0x94   :  { %v272_v33 = vadd.s32 %v268_v18, %v260_v12  ;;  %v273_v37 = vadd.s32 %v269_v19, %v261_v14  ;;  %v128_v43 = vadd.s32 %v124_v25, %v110_v16  ;;  %v129_v44 = vadd.s32 %v125_v30, %v111_v17  ;;  %v600_v17 = vld [vmem:[%s1352_s3 + $0x10] sm:$0xff]  ;;  %v599_v18 = vld [vmem:[%s1352_s3 + $0x8] sm:$0xff]  ;;  %v598_v19 = vld [vmem:[%s1352_s3] sm:$0xff] }
  0x95   :  { %v270_v36 = vadd.s32 %v1197_v28, %v258_v40  ;;  %v271_v41 = vadd.s32 %v1202_v29, %v259_v45  ;;  %v126_v52 = vadd.s32 %v1187_v26, %v108_v39  ;;  %v127_v55 = vadd.s32 %v1192_v27, %v109_v42 }
  0x96   :  { %v284_v34 = vadd.s32 %v280_v31, %v272_v33  ;;  %v285_v63 = vadd.s32 %v281_v32, %v273_v37  ;;  %v146_v48 = vadd.s32 %v1257_v53, %v128_v43  ;;  %v147_v49 = vadd.s32 %v1263_v54, %v129_v44 }
  0x97   :  { %v132_v38 = vpop.permute.xlu1 %131  ;;  %vm606_vm0 = vcmask 261120  }
  0x98   :  { %vm274_vm6 = vcmp.eq.s32.totalorder %v132_v38, %v959_v23  ;;  %vm275_vm7 = vcmp.eq.s32.totalorder %v132_v38, %v962_v24  ;;  %vm136_vm10 = vcmp.eq.s32.totalorder %v132_v38, %v929_v13  ;;  %vm137_vm11 = vcmp.eq.s32.totalorder %v132_v38, %v950_v20 }
  0x99   :  { %v278_v0 = vsel %vm274_vm6, 1, %v876_v2  ;;  %v279_v35 = vsel %vm275_vm7, 1, %v876_v2  ;;  %v140_v50 = vsel %vm136_vm10, 1, %v876_v2  ;;  %v141_v51 = vsel %vm137_vm11, 1, %v876_v2 }
  0x9a   :  { %v282_v56 = vadd.s32 %v278_v0, %v270_v36  ;;  %v296_v57 = vadd.s32 %v292_v61, %v284_v34  ;;  %v283_v58 = vadd.s32 %v279_v35, %v271_v41  ;;  %v297_v59 = vadd.s32 %v293_v62, %v285_v63  ;;  %v848_v62 = vld [vmem:[%s1353_s4] ss:$0 sm:$0xff] }
  0x9b   :  { %v144_v53 = vadd.s32 %v140_v50, %v126_v52  ;;  %v164_v1 = vadd.s32 %v160_v46, %v146_v48  ;;  %v145_v54 = vadd.s32 %v141_v51, %v127_v55  ;;  %v165_v3 = vadd.s32 %v161_v47, %v147_v49 }
  0x9c   :  { %v300_v8 = vcvt.s32.f32 %v296_v57 }
  0x9d   :  { %v168_v9 = vcvt.s32.f32 %v164_v1 }
  0xa0   :  { %v150_v60 = vpop.permute.xlu1 %149 }
  0xa1   :  { %vm154_vm12 = vcmp.eq.s32.totalorder %v150_v60, %v929_v13  ;;  %vm155_vm13 = vcmp.eq.s32.totalorder %v150_v60, %v950_v20  ;;  %vm286_vm14 = vcmp.eq.s32.totalorder %v150_v60, %v959_v23  ;;  %vm287_vm15 = vcmp.eq.s32.totalorder %v150_v60, %v962_v24 }
  0xa2   :  { %v290_v26 = vsel %vm286_vm14, 1, %v876_v2  ;;  %v291_v27 = vsel %vm287_vm15, 1, %v876_v2  ;;  %v158_v28 = vsel %vm154_vm12, 1, %v876_v2  ;;  %v159_v29 = vsel %vm155_vm13, 1, %v876_v2  ;;  %v601_v2 = vld [vmem:[%s1352_s3 + $0x18] sm:$0xff] }
  0xa3   :  { %v294_v4 = vadd.s32 %v290_v26, %v282_v56  ;;  %v295_v5 = vadd.s32 %v291_v27, %v283_v58  ;;  %v162_v6 = vadd.s32 %v158_v28, %v144_v53  ;;  %v163_v7 = vadd.s32 %v159_v29, %v145_v54  ;;  %625 = vmatpush.msrb.mxu0 %v601_v2 }
  0xa4   :  { %v301_v13 = vcvt.s32.f32 %v297_v59  ;;  %v169_v20 = vcvt.s32.f32 %v165_v3  ;;  %818 = vmatpush.msrb.mxu1 %v601_v2 }
  0xa5   :  { %v298_v10 = vcvt.s32.f32 %v294_v4  ;;  %v299_v23 = vcvt.s32.f32 %v295_v5  ;;  %v166_v11 = vcvt.s32.f32 %v162_v6  ;;  %v167_v24 = vcvt.s32.f32 %v163_v7  ;;  %626 = vmatpush.msrb.mxu0 %v600_v17 }
  0xa6   :  { %819 = vmatpush.msrb.mxu1 %v600_v17 }
  0xa7   :  { %v302_v12 = vpack.c.bf16 %v300_v8, %v298_v10  ;;  %v303_v14 = vpack.c.bf16 %v301_v13, %v299_v23  ;;  %v170_v15 = vpack.c.bf16 %v168_v9, %v166_v11  ;;  %v171_v16 = vpack.c.bf16 %v169_v20, %v167_v24  ;;  %627 = vmatpush.msrb.mxu0 %v599_v18 }
  0xa8   :  { %820 = vmatpush.msrb.mxu1 %v599_v18 }
  0xa9   :  { %440 = vmatmul.bf16.vlgmr.msra.gmra.mxu0 %v302_v12  ;;  %454 = vmatmul.bf16.vlgmr.msra.gmra.mxu1 %v303_v14 }
  0xaa   :  { %564 = vmatmul.bf16.vlgmr.msra.gmra.mxu2 %v170_v15  ;;  %578 = vmatmul.bf16.vlgmr.msra.gmra.mxu3 %v171_v16 }
  0xab   :  { %628 = vmatpush.msrb.mxu0 %v598_v19  ;;  %821 = vmatpush.msrb.mxu1 %v598_v19 }
  0xef   :  { %v589_v33 = vpop.permute.xlu0 %588 }
  0xf5   :  { %v594_v46 = vpop.permute.xlu1 %593 }
 0x126   :  { %v441_v21 = vpop.f32.mrf.mxu0  ;;  %v455_v22 = vpop.f32.mrf.mxu1 }
 0x127   :  { %v456_v25 = vadd.f32 %v455_v22, %v441_v21 }
 0x12d   :  { %v565_v30 = vpop.f32.mrf.mxu2  ;;  %v579_v31 = vpop.f32.mrf.mxu3 }
 0x12e   :  { %v566_v32 = vadd.f32 %v565_v30, %v456_v25  ;;  %v443_v38 = vpop.f32.mrf.mxu0  ;;  %v457_v39 = vpop.f32.mrf.mxu1 }
 0x12f   :  { %v458_v43 = vadd.f32 %v457_v39, %v443_v38 }
 0x130   :  { %v580_v37 = vadd.f32 %v579_v31, %v566_v32 }
 0x132   :  { %v596_v42 = vmul.f32 %v589_v33, %v580_v37 }
 0x134   :  { %784 = vmatmul.msk.f32.vlgmr.msrb.gmra.mxu0 %vm606_vm0, %v596_v42 }
 0x135   :  { %v567_v44 = vpop.f32.mrf.mxu2  ;;  %v581_v45 = vpop.f32.mrf.mxu3 }
 0x136   :  { %v568_v40 = vadd.f32 %v567_v44, %v458_v43 }
 0x138   :  { %v582_v47 = vadd.f32 %v581_v45, %v568_v40 }
 0x13a   :  { %v597_v61 = vmul.f32 %v594_v46, %v582_v47 }
 0x13c   :  { %785 = vmatmul.msk.f32.vlgmr.msrb.gmra.mxu1 %vm606_vm0, %v597_v61 }
 0x1b1   :  { %v630_v34 = vpop.f32.mrf.mxu0 }
 0x1b2   :  { %v631_v63 = vadd.f32 %v848_v62, %v630_v34 }
 0x1b4   :  { %636 = vst [vmem:[#allocation2] sm:$0xff] %v631_v63 }
 0x1b9   :  { %v633_v0 = vpop.f32.mrf.mxu1 }
 0x1ba   :  { %v634_v35 = vadd.f32 %v848_v62, %v633_v0 }
 0x1bc   :  { %637 = vst [vmem:[#allocation2 + $0x8] sm:$0xff] %v634_v35 }
 0x1bd   :  { %650 = dma.vmem_to_hbm [thread:$0]  %s643_s20, 256, %s645_s22, [#allocation3], %s884_s23, %s884_s23, %s885_s24  }
 0x1be   :  { %873 = dma.done.wait [#allocation3], 256  }
 0x1bf   :  { %874 = vsyncadd [#allocation3], 4294967040 }
 0x1c0   :  { %655 = vsyncpa [#allocation3], 1 }

</bundles_post_ra>
